<compile_context>
chip_gen: v6e
topology: v6e:2x2x1
jax: 0.10.0
libtpu: 0.0.40
codegen_flags: <defaults>
</compile_context>

<pallas_src>
import jax
import jax.numpy as jnp
from jax.experimental import pallas as pl
from jax.experimental.pallas import tpu as pltpu


def _round_up(n, m):
    return ((n + m - 1) // m) * m


def _pick_batch_tile(B):
    # Largest tile (<=512) that still leaves >=4 grid steps so the x/out DMAs
    # actually pipeline and both v7x TensorCores get work; v6e/v7x MXUs want
    # 256 rows when the batch is big enough, v5e is already full at 128.
    for cand in (512, 256, 128, 64, 32, 16, 8):
        if B >= 4 * cand:
            return cand
    return max(8, _round_up(min(B, 256), 8))


def _physical_vmem_bytes():
    try:
        info = pltpu.get_tpu_info()
        for attr in ("vmem_capacity_bytes", "vmem_bytes", "vmem_size_bytes"):
            v = getattr(info, attr, None)
            if v:
                return int(v)
    except Exception:
        pass
    return 64 * 1024 * 1024  # conservative: v7x per-TensorCore VMEM


def mlp_kernel(x_ref, w1_ref, b1_ref, w2_ref, b2_ref, o_ref):
    # fc1: cast the f32 x tile to bf16 right before the MXU; accumulate in f32.
    x = x_ref[...].astype(w1_ref.dtype)
    h = jnp.dot(x, w1_ref[...], preferred_element_type=jnp.float32)
    h = jnp.maximum(h + b1_ref[...], 0.0)  # bias + ReLU epilogue in f32 (VPU)
    # TODO(synk): for tb>=256 or Din>=512, stage h through a VMEM scratch and
    # consume it in K-chunks for fc2 (and K-tile the weights on an "arbitrary"
    # grid axis for Din beyond ~2.5k) instead of holding tb x Din f32 live.
    out = jnp.dot(h.astype(w2_ref.dtype), w2_ref[...],
                  preferred_element_type=jnp.float32)
    o_ref[...] = (out + b2_ref[...]).astype(o_ref.dtype)


def prepare_mlp_params(w1, b1, w2, b2, *, weight_dtype=jnp.bfloat16):
    """Pad feature dims to lane-dense multiples of 128 and cast weights ONCE.

    Call this at module-init time and reuse the result across forward calls so
    the per-call path never re-pads / re-casts the (dominant) weight bytes.
    Zero padding keeps the math exact: padded b1 entries are 0, so padded
    hidden columns stay 0 through ReLU and padded W2 rows contribute nothing.
    """
    Din = w1.shape[0]
    Dout = w2.shape[1]
    assert w1.shape == (Din, Din) and b1.shape == (Din,)
    assert w2.shape == (Din, Dout) and b2.shape == (Dout,)
    f32 = jnp.float32
    Din_p = _round_up(Din, 128)
    Dout_p = _round_up(Dout, 128)
    w1_p = jnp.zeros((Din_p, Din_p), f32).at[:Din, :Din].set(w1).astype(weight_dtype)
    w2_p = jnp.zeros((Din_p, Dout_p), f32).at[:Din, :Dout].set(w2).astype(weight_dtype)
    b1_p = jnp.zeros((1, Din_p), f32).at[0, :Din].set(b1)
    b2_p = jnp.zeros((1, Dout_p), f32).at[0, :Dout].set(b2)
    return {"w1": w1_p, "b1": b1_p, "w2": w2_p, "b2": b2_p,
            "in_dim": Din, "out_dim": Dout}


def mlp_pallas(x, params, *, tb=None, out_dtype=jnp.float32):
    """Fused MLP forward. x: (B, Din) f32; params from prepare_mlp_params()."""
    B, Din = x.shape
    assert Din == params["in_dim"]
    Dout = params["out_dim"]
    w1_p, b1_p, w2_p, b2_p = params["w1"], params["b1"], params["w2"], params["b2"]
    Din_p = w1_p.shape[0]
    Dout_p = w2_p.shape[1]

    tb_eff = _pick_batch_tile(B) if tb is None else max(8, _round_up(min(tb, B), 8))
    B_p = _round_up(B, tb_eff)

    # Pad x only when required; at aligned shapes the kernel reads x straight
    # from its original f32 buffer (no extra HBM pass, no standalone cast op).
    if (B_p, Din_p) == (B, Din):
        x_p = x
    else:
        x_p = jnp.zeros((B_p, Din_p), x.dtype).at[:B, :Din].set(x)

    grid = (B_p // tb_eff,)

    # --- VMEM budget with headroom, generation-aware cap (v7x has 64 MiB). ---
    out_itemsize = jnp.dtype(out_dtype).itemsize
    w_bytes = w1_p.size * w1_p.dtype.itemsize + w2_p.size * w2_p.dtype.itemsize
    b_bytes = (b1_p.size + b2_p.size) * 4
    tile_bytes = 2 * tb_eff * (Din_p * x_p.dtype.itemsize + Dout_p * out_itemsize)
    vmem_needed = 2 * (w_bytes + b_bytes) + tile_bytes  # worst case: dbl-buffered weights
    phys = _physical_vmem_bytes()
    vmem_limit = int(min(max(vmem_needed * 3 // 2 + (4 << 20), 16 << 20),
                         (phys * 3) // 4))

    # Advisory cost estimate so XLA schedules surrounding HBM traffic sensibly.
    flops = 2 * B_p * Din_p * (Din_p + Dout_p)
    bytes_accessed = (x_p.size * x_p.dtype.itemsize + w_bytes + b_bytes
                      + B_p * Dout_p * out_itemsize)
    cost = pl.CostEstimate(flops=flops, transcendentals=0,
                           bytes_accessed=bytes_accessed)

    def build(single_buffer_weights):
        def resident(shape):
            # Constant index map -> block never changes; single-buffer it so
            # resident weights don't eat 2x VMEM (matters at large Din on v7x).
            if single_buffer_weights:
                return pl.BlockSpec(shape, lambda i: (0,) * len(shape),
                                    pipeline_mode=pl.Buffered(1))
            return pl.BlockSpec(shape, lambda i: (0,) * len(shape))

        return pl.pallas_call(
            mlp_kernel,
            out_shape=jax.ShapeDtypeStruct((B_p, Dout_p), out_dtype),
            grid_spec=pltpu.PrefetchScalarGridSpec(
                num_scalar_prefetch=0,
                grid=grid,
                in_specs=[
                    pl.BlockSpec((tb_eff, Din_p), lambda i: (i, 0)),  # x tile (f32)
                    resident((Din_p, Din_p)),                         # W1 (bf16)
                    resident((1, Din_p)),                             # b1 (f32)
                    resident((Din_p, Dout_p)),                        # W2 (bf16)
                    resident((1, Dout_p)),                            # b2 (f32)
                ],
                out_specs=pl.BlockSpec((tb_eff, Dout_p), lambda i: (i, 0)),
            ),
            compiler_params=pltpu.CompilerParams(
                # TODO(synk): on v7x, verify "parallel" actually shards batch
                # tiles across both TensorCores; otherwise switch to
                # pl.core_map / CORE_PARALLEL semantics.
                dimension_semantics=("parallel",),
                vmem_limit_bytes=vmem_limit,
            ),
            cost_estimate=cost,
        )

    single_buffer = hasattr(pl, "Buffered")
    try:
        out_p = build(single_buffer)(x_p, w1_p, b1_p, w2_p, b2_p)
    except Exception:
        if not single_buffer:
            raise
        # Fallback: default (double-buffered) specs if Buffered(1) is rejected.
        out_p = build(False)(x_p, w1_p, b1_p, w2_p, b2_p)

    # Skip the extra HBM copy from slicing when the output is already aligned.
    if (B_p, Dout_p) == (B, Dout):
        return out_p
    return out_p[:B, :Dout]


def mlp_reference(x, w1, b1, w2, b2):
    h = jnp.maximum(x @ w1 + b1, 0.0)
    return h @ w2 + b2


if __name__ == "__main__":
    # Shapes implied by MLP(input_dim, output_dim): x is (batch, input_dim).
    B, D_IN, D_OUT = 256, 128, 64

    key = jax.random.PRNGKey(0)
    k_x, k_w1, k_b1, k_w2, k_b2 = jax.random.split(key, 5)

    x = jax.random.normal(k_x, (B, D_IN), dtype=jnp.float32)

    # Deterministic parameter init (uniform, roughly nn.Linear scale),
    # stored as (in_features, out_features).
    lim1 = 1.0 / jnp.sqrt(D_IN)
    w1 = jax.random.uniform(k_w1, (D_IN, D_IN), minval=-lim1, maxval=lim1,
                            dtype=jnp.float32)
    b1 = jax.random.uniform(k_b1, (D_IN,), minval=-lim1, maxval=lim1,
                            dtype=jnp.float32)
    w2 = jax.random.uniform(k_w2, (D_IN, D_OUT), minval=-lim1, maxval=lim1,
                            dtype=jnp.float32)
    b2 = jax.random.uniform(k_b2, (D_OUT,), minval=-lim1, maxval=lim1,
                            dtype=jnp.float32)

    # Pad / cast the weights ONCE (init-time path), reuse across forward calls.
    params = prepare_mlp_params(w1, b1, w2, b2)

    out = mlp_pallas(x, params)
    out = jax.block_until_ready(out)

    ref = mlp_reference(x, w1, b1, w2, b2)
    assert out.shape == (B, D_OUT)
    # bf16 MXU operands (f32 accumulation) vs pure-f32 reference: tolerance
    # loosened accordingly.
    assert jnp.allclose(out, ref, atol=5e-2, rtol=5e-2), (
        "mismatch vs reference, max abs err = "
        f"{float(jnp.max(jnp.abs(out - ref)))}")

    print("KERNEL_OK")
</pallas_src>

<mosaic_0001>
module attributes {stable_mosaic.version = 11 : i64} {
  func.func @mlp_kernel(%arg0: i32, %arg1: memref<64x128xf32, #tpu.memory_space<vmem>>, %arg2: memref<128x128xbf16, #tpu.memory_space<vmem>>, %arg3: memref<1x128xf32, #tpu.memory_space<vmem>>, %arg4: memref<128x128xbf16, #tpu.memory_space<vmem>>, %arg5: memref<1x128xf32, #tpu.memory_space<vmem>>, %arg6: memref<64x128xf32, #tpu.memory_space<vmem>>) attributes {dimension_semantics = [#tpu.dimension_semantics<parallel>], iteration_bounds = array<i64: 4>, scalar_prefetch = 0 : i64, scratch_operands = 0 : i64, tpu.core_type = #tpu.core_type<tc>, window_params = [{transform_indices = @transform_0, window_bounds = array<i64: 64, 128>}, {pipeline_mode = #tpu.pipeline_mode<synchronous>, transform_indices = @transform_1, window_bounds = array<i64: 128, 128>}, {pipeline_mode = #tpu.pipeline_mode<synchronous>, transform_indices = @transform_2, window_bounds = array<i64: 1, 128>}, {pipeline_mode = #tpu.pipeline_mode<synchronous>, transform_indices = @transform_3, window_bounds = array<i64: 128, 128>}, {pipeline_mode = #tpu.pipeline_mode<synchronous>, transform_indices = @transform_4, window_bounds = array<i64: 1, 128>}, {transform_indices = @transform_5, window_bounds = array<i64: 64, 128>}]} {
    %c0 = arith.constant 0 : index
    %c0_0 = arith.constant 0 : index
    %0 = vector.load %arg1[%c0, %c0_0] : memref<64x128xf32, #tpu.memory_space<vmem>>, vector<64x128xf32>
    %1 = arith.truncf %0 : vector<64x128xf32> to vector<64x128xbf16>
    %c0_1 = arith.constant 0 : index
    %c0_2 = arith.constant 0 : index
    %2 = vector.load %arg2[%c0_1, %c0_2] : memref<128x128xbf16, #tpu.memory_space<vmem>>, vector<128x128xbf16>
    %cst = arith.constant dense<0.000000e+00> : vector<64x128xf32>
    %3 = tpu.matmul %1, %2, %cst {dimension_numbers = #tpu.dot_dimension_numbers<[1], [0], [0], [1], [0, 0, 1, 1], [], []>} : vector<64x128xbf16>, vector<128x128xbf16>, vector<64x128xf32> -> vector<64x128xf32>
    %c0_3 = arith.constant 0 : index
    %c0_4 = arith.constant 0 : index
    %4 = vector.load %arg3[%c0_3, %c0_4] : memref<1x128xf32, #tpu.memory_space<vmem>>, vector<1x128xf32>
    %5 = vector.broadcast %4 : vector<1x128xf32> to vector<64x128xf32>
    %6 = arith.addf %3, %5 : vector<64x128xf32>
    %cst_5 = arith.constant 0.000000e+00 : f32
    %7 = vector.broadcast %cst_5 : f32 to vector<64x128xf32>
    %8 = arith.maximumf %6, %7 : vector<64x128xf32>
    %9 = arith.truncf %8 : vector<64x128xf32> to vector<64x128xbf16>
    %c0_6 = arith.constant 0 : index
    %c0_7 = arith.constant 0 : index
    %10 = vector.load %arg4[%c0_6, %c0_7] : memref<128x128xbf16, #tpu.memory_space<vmem>>, vector<128x128xbf16>
    %cst_8 = arith.constant dense<0.000000e+00> : vector<64x128xf32>
    %11 = tpu.matmul %9, %10, %cst_8 {dimension_numbers = #tpu.dot_dimension_numbers<[1], [0], [0], [1], [0, 0, 1, 1], [], []>} : vector<64x128xbf16>, vector<128x128xbf16>, vector<64x128xf32> -> vector<64x128xf32>
    %c0_9 = arith.constant 0 : index
    %c0_10 = arith.constant 0 : index
    %12 = vector.load %arg5[%c0_9, %c0_10] : memref<1x128xf32, #tpu.memory_space<vmem>>, vector<1x128xf32>
    %13 = vector.broadcast %12 : vector<1x128xf32> to vector<64x128xf32>
    %14 = arith.addf %11, %13 : vector<64x128xf32>
    %c0_11 = arith.constant 0 : index
    %c0_12 = arith.constant 0 : index
    %15 = vector.load %arg6[%c0_11, %c0_12] : memref<64x128xf32, #tpu.memory_space<vmem>>, vector<64x128xf32>
    tpu.vector_store %arg6[%c0_11, %c0_12], %14 {strides = array<i32>} : memref<64x128xf32, #tpu.memory_space<vmem>>, vector<64x128xf32>,
    return
  }
  func.func @transform_0(%arg0: i32) -> (i32, i32) {
    %c0_i32 = arith.constant 0 : i32
    %c0_i32_0 = arith.constant 0 : i32
    return %arg0, %c0_i32 : i32, i32
  }
  func.func @transform_1(%arg0: i32) -> (i32, i32) {
    %c0_i32 = arith.constant 0 : i32
    %c0_i32_0 = arith.constant 0 : i32
    %c0_i32_1 = arith.constant 0 : i32
    return %c0_i32, %c0_i32_0 : i32, i32
  }
  func.func @transform_2(%arg0: i32) -> (i32, i32) {
    %c0_i32 = arith.constant 0 : i32
    %c0_i32_0 = arith.constant 0 : i32
    %c0_i32_1 = arith.constant 0 : i32
    return %c0_i32, %c0_i32_0 : i32, i32
  }
  func.func @transform_3(%arg0: i32) -> (i32, i32) {
    %c0_i32 = arith.constant 0 : i32
    %c0_i32_0 = arith.constant 0 : i32
    %c0_i32_1 = arith.constant 0 : i32
    return %c0_i32, %c0_i32_0 : i32, i32
  }
  func.func @transform_4(%arg0: i32) -> (i32, i32) {
    %c0_i32 = arith.constant 0 : i32
    %c0_i32_0 = arith.constant 0 : i32
    %c0_i32_1 = arith.constant 0 : i32
    return %c0_i32, %c0_i32_0 : i32, i32
  }
  func.func @transform_5(%arg0: i32) -> (i32, i32) {
    %c0_i32 = arith.constant 0 : i32
    %c0_i32_0 = arith.constant 0 : i32
    return %arg0, %c0_i32 : i32, i32
  }
}

module attributes {stable_mosaic.version = 11 : i64} {
  func.func @mlp_kernel(%arg0: i32, %arg1: memref<64x128xf32, #tpu.memory_space<vmem>>, %arg2: memref<128x128xbf16, #tpu.memory_space<vmem>>, %arg3: memref<1x128xf32, #tpu.memory_space<vmem>>, %arg4: memref<128x128xbf16, #tpu.memory_space<vmem>>, %arg5: memref<1x128xf32, #tpu.memory_space<vmem>>, %arg6: memref<64x128xf32, #tpu.memory_space<vmem>>) attributes {dimension_semantics = [#tpu.dimension_semantics<parallel>], iteration_bounds = array<i64: 4>, scalar_prefetch = 0 : i64, scratch_operands = 0 : i64, tpu.core_type = #tpu.core_type<tc>, window_params = [{transform_indices = @transform_0, window_bounds = array<i64: 64, 128>}, {pipeline_mode = #tpu.pipeline_mode<synchronous>, transform_indices = @transform_1, window_bounds = array<i64: 128, 128>}, {pipeline_mode = #tpu.pipeline_mode<synchronous>, transform_indices = @transform_2, window_bounds = array<i64: 1, 128>}, {pipeline_mode = #tpu.pipeline_mode<synchronous>, transform_indices = @transform_3, window_bounds = array<i64: 128, 128>}, {pipeline_mode = #tpu.pipeline_mode<synchronous>, transform_indices = @transform_4, window_bounds = array<i64: 1, 128>}, {transform_indices = @transform_5, window_bounds = array<i64: 64, 128>}]} {
    %c0 = arith.constant 0 : index
    %c0_0 = arith.constant 0 : index
    %0 = vector.load %arg1[%c0, %c0_0] : memref<64x128xf32, #tpu.memory_space<vmem>>, vector<64x128xf32>
    %1 = arith.truncf %0 : vector<64x128xf32> to vector<64x128xbf16>
    %c0_1 = arith.constant 0 : index
    %c0_2 = arith.constant 0 : index
    %2 = vector.load %arg2[%c0_1, %c0_2] : memref<128x128xbf16, #tpu.memory_space<vmem>>, vector<128x128xbf16>
    %cst = arith.constant dense<0.000000e+00> : vector<64x128xf32>
    %3 = tpu.matmul %1, %2, %cst {dimension_numbers = #tpu.dot_dimension_numbers<[1], [0], [0], [1], [0, 0, 1, 1], [], []>} : vector<64x128xbf16>, vector<128x128xbf16>, vector<64x128xf32> -> vector<64x128xf32>
    %c0_3 = arith.constant 0 : index
    %c0_4 = arith.constant 0 : index
    %4 = vector.load %arg3[%c0_3, %c0_4] : memref<1x128xf32, #tpu.memory_space<vmem>>, vector<1x128xf32>
    %5 = vector.broadcast %4 : vector<1x128xf32> to vector<64x128xf32>
    %6 = arith.addf %3, %5 : vector<64x128xf32>
    %cst_5 = arith.constant 0.000000e+00 : f32
    %7 = vector.broadcast %cst_5 : f32 to vector<64x128xf32>
    %8 = arith.maximumf %6, %7 : vector<64x128xf32>
    %9 = arith.truncf %8 : vector<64x128xf32> to vector<64x128xbf16>
    %c0_6 = arith.constant 0 : index
    %c0_7 = arith.constant 0 : index
    %10 = vector.load %arg4[%c0_6, %c0_7] : memref<128x128xbf16, #tpu.memory_space<vmem>>, vector<128x128xbf16>
    %cst_8 = arith.constant dense<0.000000e+00> : vector<64x128xf32>
    %11 = tpu.matmul %9, %10, %cst_8 {dimension_numbers = #tpu.dot_dimension_numbers<[1], [0], [0], [1], [0, 0, 1, 1], [], []>} : vector<64x128xbf16>, vector<128x128xbf16>, vector<64x128xf32> -> vector<64x128xf32>
    %c0_9 = arith.constant 0 : index
    %c0_10 = arith.constant 0 : index
    %12 = vector.load %arg5[%c0_9, %c0_10] : memref<1x128xf32, #tpu.memory_space<vmem>>, vector<1x128xf32>
    %13 = vector.broadcast %12 : vector<1x128xf32> to vector<64x128xf32>
    %14 = arith.addf %11, %13 : vector<64x128xf32>
    %c0_11 = arith.constant 0 : index
    %c0_12 = arith.constant 0 : index
    %15 = vector.load %arg6[%c0_11, %c0_12] : memref<64x128xf32, #tpu.memory_space<vmem>>, vector<64x128xf32>
    tpu.vector_store %arg6[%c0_11, %c0_12], %14 {strides = array<i32>} : memref<64x128xf32, #tpu.memory_space<vmem>>, vector<64x128xf32>,
    return
  }
  func.func @transform_0(%arg0: i32) -> (i32, i32) {
    %c0_i32 = arith.constant 0 : i32
    %c0_i32_0 = arith.constant 0 : i32
    return %arg0, %c0_i32 : i32, i32
  }
  func.func @transform_1(%arg0: i32) -> (i32, i32) {
    %c0_i32 = arith.constant 0 : i32
    %c0_i32_0 = arith.constant 0 : i32
    %c0_i32_1 = arith.constant 0 : i32
    return %c0_i32, %c0_i32_0 : i32, i32
  }
  func.func @transform_2(%arg0: i32) -> (i32, i32) {
    %c0_i32 = arith.constant 0 : i32
    %c0_i32_0 = arith.constant 0 : i32
    %c0_i32_1 = arith.constant 0 : i32
    return %c0_i32, %c0_i32_0 : i32, i32
  }
  func.func @transform_3(%arg0: i32) -> (i32, i32) {
    %c0_i32 = arith.constant 0 : i32
    %c0_i32_0 = arith.constant 0 : i32
    %c0_i32_1 = arith.constant 0 : i32
    return %c0_i32, %c0_i32_0 : i32, i32
  }
  func.func @transform_4(%arg0: i32) -> (i32, i32) {
    %c0_i32 = arith.constant 0 : i32
    %c0_i32_0 = arith.constant 0 : i32
    %c0_i32_1 = arith.constant 0 : i32
    return %c0_i32, %c0_i32_0 : i32, i32
  }
  func.func @transform_5(%arg0: i32) -> (i32, i32) {
    %c0_i32 = arith.constant 0 : i32
    %c0_i32_0 = arith.constant 0 : i32
    return %arg0, %c0_i32 : i32, i32
  }
}

</mosaic_0001>

<bundles_post_ra>
// kernel: tpu_custom_call.1
= control target key start
LH: loop header
LB: loop body
LE: loop exit
PB: predicated region body
PF: predicated region fallthrough
CT: control target
= control target key end

     0   :  { %10 = vsyncpa [#allocation3], 0  ;;  %s1280_s0 = inlined_call_operand.hbm [shape: f32[256,128], index: 0, kind: input, shape index: {}]   ;;  %s1281_s1 = inlined_call_operand.hbm [shape: bf16[128,128], index: 1, kind: input, shape index: {}]   ;;  %s1282_s2 = inlined_call_operand.vmem [shape: f32[1,128], index: 2, kind: input, shape index: {}]   ;;  %s1283_s3 = inlined_call_operand.hbm [shape: bf16[128,128], index: 3, kind: input, shape index: {}]   ;;  %s1284_s4 = inlined_call_operand.vmem [shape: f32[1,128], index: 4, kind: input, shape index: {}]   ;;  %s1285_s5 = inlined_call_operand.hbm [shape: f32[256,128], index: 5, kind: output, shape index: {}]  }
   0x1   :  { %12 = vsyncpa [#allocation3 + $0x1], 0 }
   0x2   :  { %13 = vsyncpa [#allocation6], 0 }
   0x3   :  { %14 = vsyncpa [#allocation4], 0 }
   0x4   :  { %16 = vsyncpa [#allocation4 + $0x1], 0  ;;  %s1074_s18 = smov 0   ;;  %s1076_s19 = smov 0  }
   0x5   :  { %s1078_s20 = smov 0   ;;  %s1080_s21 = smov 0  }
   0x6 LB: > { %s1095_s22 = sadd.s32 4294967295, %s1032_s21   ;;  %s685_s23 = sadd.s32 4294967294, %s1032_s21   ;;  %s1032_s21 = sphi %s1080_s21, %s1306_s21   ;;  %s1028_s20 = sphi %s1078_s20, %s1305_s20   ;;  %s1024_s19 = sphi %s1076_s19, %s1304_s19   ;;  %s1020_s18 = sphi %s1074_s18, %s1303_s18  }
   0x7   : > { %p42_p0 = scmp.ne.s32.totalorder %s1024_s19, %s1020_s18  ;;  %p1286_p1 = scmp.eq.s32.totalorder %s1095_s22, 0 }
   0x8   : > { %p156_p3 = scmp.eq.s32.totalorder %s685_s23, 3  ;;  %p686_p5 = scmp.ge.s32.totalorder %s1032_s21, 1 }
   0x9   : > { %p1104_p4 = por %p1286_p1, %p42_p0  ;;  %p163_p7 = scmp.lt.s32.totalorder %s1032_s21, 5 }
   0xa   : > { %p1109_p6 = por %p156_p3, %p42_p0  ;;  %s1034_s27 = smov [#allocation5]  }
   0xb   : > { %s1290_s24 = scalar_select %p1104_p4, 1, 0 }
   0xc   : > { %s1291_s25 = scalar_select %p1109_p6, 1, 0 }
   0xd   : > { %p1114_p8 = pnand %p686_p5, %p163_p7  ;;  %s175_s28 = sshll.u32 %s1034_s27, 4  ;;  %s176_s28 = int_to_ptr.vmem [resolvable:$true] %s175_s28 }
   0xe   : > { %s1035_s30 = smov [#allocation7]   ;;  %s895_s7 = scalar_lea.vmem %s176_s28, 1024 }
   0xf   : > { %s1292_s26 = scalar_select %p1114_p8, 1, 0 }
  0x10   : > { %p807_p9 = pneg %p1114_p8  ;;  %s191_s6 = sshll.u32 %s1035_s30, 4  ;;  %s192_s6 = int_to_ptr.vmem [resolvable:$true] %s191_s6 }
  0x11   : > { %p896_p12 = scmp.ne.s32.totalorder %s176_s28, %s895_s7  ;;  %p903_p3 = scmp.lt.s32.totalorder %s176_s28, %s176_s28 }
  0x12   : > { %p1122_p10 = pnand %p807_p9, %p1286_p1  ;;  %p904_p5 = scmp.lt.s32.totalorder %s895_s7, %s895_s7 }
  0x14   : > { %p886_p11 = pneg %p1122_p10  ;;  %p905_p7 = por %p904_p5, %p903_p3 }
  0x16   : > { %p898_p13 = pnand %p896_p12, %p886_p11 }
  0x18   : > { %p899_p0 = pneg %p898_p13 }
  0x1a   : > { %p906_p9 = pnand %p905_p7, %p899_p0 }
  0x1c   : > { %909 = shalt.err (!%p906_p9)
}
  0x1d   : > { %s1036_s8 = smov 64   ;;  %s1037_s9 = smov 4  }
  0x1e   : > { %810 = dma.hbm_to_vmem [thread:$0]  (!%p1122_p10), %s1281_s1, 1024, %s176_s28, [#allocation6], %s1036_s8, %s1036_s8, %s1037_s9  }
  0x1f   : > { %s921_s12 = scalar_lea.vmem %s192_s6, 1024  ;;  %p929_p2 = scmp.lt.s32.totalorder %s192_s6, %s192_s6 }
  0x20   : > { %p922_p1 = scmp.ne.s32.totalorder %s192_s6, %s921_s12  ;;  %p930_p6 = scmp.lt.s32.totalorder %s921_s12, %s921_s12 }
  0x22   : > { %p924_p12 = pnand %p922_p1, %p886_p11  ;;  %p931_p3 = por %p930_p6, %p929_p2 }
  0x24   : > { %p925_p13 = pneg %p924_p12 }
  0x26   : > { %p932_p0 = pnand %p931_p3, %p925_p13 }
  0x28   : > { %935 = shalt.err (!%p932_p0)
}
  0x29   : > { %813 = dma.hbm_to_vmem [thread:$0]  (!%p1122_p10), %s1283_s3, 1024, %s192_s6, [#allocation6], %s1036_s8, %s1036_s8, %s1037_s9  }
  0x2a   : > { %s1145_s15 = sadd.s32 1, %s1032_s21   ;;  %s29_s16 = sadd.s32 1, %s1028_s20 }
  0x2b   : > { %s26_s17 = ssub.s32 %s1032_s21, %s1145_s15  ;;  %p36_p1 = scmp.ne.s32.totalorder %s1028_s20, %s1024_s19 }
  0x2c   : > { %p27_p2 = scmp.eq.s32.totalorder %s26_s17, 0  ;;  %p37_p6 = scmp.eq.s32.totalorder %s1032_s21, 0 }
  0x2d   : > { %p1294_p11 = scmp.eq.s32.totalorder %s1095_s22, 3  ;;  %p824_p7 = scmp.lt.s32.totalorder %s1032_s21, 4 }
  0x2e   : > { %s1161_s27 = scalar_select %p27_p2, %s1028_s20, %s29_s16  }
  0x2f   : > { %p1155_p5 = por %p1294_p11, %p36_p1  ;;  %p38_p9 = por %p37_p6, %p36_p1 }
  0x30   : > { %s208_s28 = sand.u32 1, %s1028_s20   ;;  %s721_s30 = sshll.u32 %s1032_s21, 10 }
  0x31   : > { %s1295_s23 = scalar_select %p1155_p5, 1, 0 }
  0x32   : > { %s690_s29 = sshll.u32 %s208_s28, 6  ;;  %s1168_s8 = scalar_lea.hbm %s1280_s0, %s721_s30 }
  0x33   : > { %s212_s9 = scalar_lea.vmem [#allocation2], %s690_s29  ;;  %p1172_p10 = pnand %p824_p7, %p38_p9 }
  0x34   : > { %s219_s10 = sshll.u32 %s212_s9, 4  ;;  %s1176_s12 = scalar_lea.sflag [#allocation3], %s208_s28  ;;  %s1170_s10 = int_to_ptr.vmem [resolvable:$true] %s219_s10 }
  0x35   : > { %s936_s13 = scalar_lea.hbm %s1168_s8, 1024  ;;  %p938_p13 = pneg %p1172_p10 }
  0x36   : > { %p937_p12 = scmp.ne.s32.totalorder %s1168_s8, %s936_s13  ;;  %s941_s17 = scalar_lea.hbm %s1280_s0, 4096 }
  0x37   : > { %p942_p1 = scmp.lt.s32.totalorder %s1168_s8, %s1280_s0  ;;  %p943_p2 = scmp.lt.s32.totalorder %s941_s17, %s936_s13 }
  0x38   : > { %p939_p3 = pnand %p938_p13, %p937_p12 }
  0x39   : > { %p944_p6 = por %p943_p2, %p942_p1 }
  0x3a   : > { %p940_p0 = pneg %p939_p3 }
  0x3c   : > { %p945_p11 = pnand %p944_p6, %p940_p0 }
  0x3e   : > { %948 = shalt.err (!%p945_p11)
}
  0x3f   : > { %s949_s28 = scalar_lea.vmem %s1170_s10, 1024  ;;  %s1038_s6 = smov [#allocation2]  }
  0x40   : > { %p950_p7 = scmp.ne.s32.totalorder %s1170_s10, %s949_s28  ;;  %s954_s7 = sshll.u32 %s1038_s6, 4  ;;  %s955_s7 = int_to_ptr.vmem [resolvable:$false] %s954_s7 }
  0x41   : > { %s956_s9 = scalar_lea.vmem %s955_s7, 2048  ;;  %p957_p3 = scmp.lt.s32.totalorder %s1170_s10, %s955_s7 }
  0x42   : > { %p952_p9 = pnand %p950_p7, %p938_p13  ;;  %p958_p5 = scmp.lt.s32.totalorder %s956_s9, %s949_s28 }
  0x44   : > { %p953_p12 = pneg %p952_p9  ;;  %p959_p4 = por %p958_p5, %p957_p3 }
  0x46   : > { %p960_p8 = pnand %p959_p4, %p953_p12 }
  0x48   : > { %963 = shalt.err (!%p960_p8)
}
  0x49   : > { %s1039_s13 = smov 128   ;;  %s1040_s14 = smov 8  }
  0x4a   : > { %817 = dma.hbm_to_vmem [thread:$0]  (!%p1172_p10), %s1168_s8, 1024, %s1170_s10, %s1176_s12, %s1039_s13, %s1039_s13, %s1040_s14  }
  0x4b   : > { %p1297_p13 = scmp.ne.s32.totalorder %s1292_s26, 0 }
  0x4c   : > { %s1200_s16 = sand.u32 (!%p1297_p13), 1, %s1024_s19   ;;  %p1298_p4 = scmp.ne.s32.totalorder (!%p1297_p13), %s1290_s24, 0 }
  0x4d   : > { %231 = sbr.rel (%p1297_p13) target bundleno = 548 (0x224), region = 40  ;;  %s694_s17 = sshll.u32 (!%p1297_p13), %s1200_s16, 6 }
  0x4e   : > { %s234_s29 = scalar_lea.sflag (!%p1297_p13), [#allocation3], %s1200_s16  ;;  %s1206_s30 = scalar_lea.vmem (!%p1297_p13), [#allocation2], %s694_s17 }
  0x52   : > { %1007 = dma.done.wait (%p1298_p4), %s234_s29, 1024  }
  0x53   : > { %1009 = vsyncadd (%p1298_p4), %s234_s29, 4294966272  ;;  %p1299_p8 = scmp.eq.s32.totalorder %s1095_s22, 0 }
  0x55   : > { %1011 = dma.done.wait (%p1299_p8), [#allocation6], 2048   ;;  %p1300_p5 = pmov %p1299_p8 }
  0x56   : > { %v868_v0 = vld [vmem:[#allocation5 + $0x38] sm:$0xff]   ;;  %v869_v1 = vld [vmem:[#allocation5 + $0x30] sm:$0xff]   ;;  %v870_v2 = vld [vmem:[#allocation5 + $0x28] sm:$0xff]   ;;  %s271_s11 = scalar_lea.vmem [#allocation8], %s694_s17  ;;  %s722_s28 = sshll.u32 %s1095_s22, 10 }
  0x57   : > { %1013 = vsyncadd (%p1300_p5), [#allocation6], 4294965248  ;;  %747 = vmatprep.subr.bf16.mxu0 %v868_v0  ;;  %v871_v3 = vld [vmem:[#allocation5 + $0x20] sm:$0xff]   ;;  %v276_v5 = vld [vmem:[%s1206_s30 + $0x8] sm:$0xff]  ;;  %s593_s12 = sshll.u32 %s271_s11, 4  ;;  %s1238_s9 = scalar_lea.hbm %s1285_s5, %s722_s28  ;;  %s1233_s12 = int_to_ptr.vmem [resolvable:$true] %s593_s12 }
  0x58   : > { %748 = vmatpush3.bf16.msra.mxu0 %v868_v0  ;;  %v275_v4 = vld [vmem:[%s1206_s30] sm:$0xff]  ;;  %v872_v7 = vld [vmem:[#allocation5 + $0x18] sm:$0xff]   ;;  %v877_v9 = vld [vmem:[#allocation7 + $0x30] sm:$0xff]   ;;  %s580_s13 = scalar_lea.sflag [#allocation4], %s1200_s16  ;;  %s964_s14 = scalar_lea.vmem %s1233_s12, 1024 }
  0x59   : > { %749 = vmatprep.subr.bf16.mxu0 %v869_v1  ;;  %v283_v6 = vpack.c.bf16 %v276_v5, %v275_v4  ;;  %v876_v8 = vld [vmem:[#allocation7 + $0x38] sm:$0xff]   ;;  %v873_v10 = vld [vmem:[#allocation5 + $0x10] sm:$0xff]   ;;  %v878_v11 = vld [vmem:[#allocation7 + $0x28] sm:$0xff]   ;;  %p965_p10 = scmp.ne.s32.totalorder %s1233_s12, %s964_s14  ;;  %p1301_p0 = scmp.ne.s32.totalorder %s1295_s23, 0 }
  0x5a   : > { %771 = vmatprep.subr.bf16.mxu1 %v876_v8  ;;  %v879_v12 = vld [vmem:[#allocation7 + $0x20] sm:$0xff]   ;;  %v874_v13 = vld [vmem:[#allocation5 + $0x8] sm:$0xff]   ;;  %v880_v14 = vld [vmem:[#allocation7 + $0x18] sm:$0xff]   ;;  %s1041_s22 = smov [#allocation8]  }
  0x5b   : > { %763 = vmatprep.mubr.bf16.mxu0 %v283_v6  ;;  %772 = vmatpush3.bf16.msra.mxu1 %v876_v8  ;;  %v875_v15 = vld [vmem:[#allocation5] sm:$0xff]   ;;  %v277_v16 = vld [vmem:[%s1206_s30 + $0x10] sm:$0xff]  ;;  %v278_v17 = vld [vmem:[%s1206_s30 + $0x18] sm:$0xff]  ;;  %p966_p1 = pnand %p965_p10, %p1301_p0  ;;  %s968_s17 = sshll.u32 %s1041_s22, 4  ;;  %s969_s17 = int_to_ptr.vmem [resolvable:$false] %s968_s17 }
  0x5c   : > { %750 = vmatpush3.bf16.msra.mxu0 %v869_v1  ;;  %773 = vmatprep.subr.bf16.mxu1 %v877_v9  ;;  %v279_v18 = vld [vmem:[%s1206_s30 + $0x20] sm:$0xff]  ;;  %v280_v19 = vld [vmem:[%s1206_s30 + $0x28] sm:$0xff]  ;;  %v284_v20 = vpack.c.bf16 %v278_v17, %v277_v16  ;;  %v281_v22 = vld [vmem:[%s1206_s30 + $0x30] sm:$0xff]  ;;  %s970_s29 = scalar_lea.vmem %s969_s17, 2048  ;;  %p971_p6 = scmp.lt.s32.totalorder %s1233_s12, %s969_s17 }
  0x5d   : > { %751 = vmatprep.subr.bf16.mxu0 %v870_v2  ;;  %v285_v21 = vpack.c.bf16 %v280_v19, %v279_v18  ;;  %v282_v23 = vld [vmem:[%s1206_s30 + $0x38] sm:$0xff]  ;;  %v881_v25 = vld [vmem:[#allocation7 + $0x10] sm:$0xff]   ;;  %v882_v26 = vld [vmem:[#allocation7 + $0x8] sm:$0xff]   ;;  %p967_p2 = pneg %p966_p1  ;;  %p972_p11 = scmp.lt.s32.totalorder %s970_s29, %s964_s14 }
  0x5e   : > { %v286_v24 = vpack.c.bf16 %v282_v23, %v281_v22  ;;  %v883_v27 = vld [vmem:[#allocation7] sm:$0xff]  }
  0x5f   : > { %774 = vmatpush3.bf16.msra.mxu1 %v877_v9  ;;  %v698_v30 = vld [vmem:[%s1282_s2] ss:$0 sm:$0xff]  ;;  %p973_p7 = por %p972_p11, %p971_p6 }
  0x60   : > { %752 = vmatpush3.bf16.msra.mxu0 %v870_v2  ;;  %775 = vmatprep.subr.bf16.mxu1 %v878_v11  ;;  %v707_v57 = vld [vmem:[%s1284_s4] ss:$0 sm:$0xff] }
  0x61   : > { %753 = vmatprep.subr.bf16.mxu0 %v871_v3  ;;  %p974_p9 = pnand %p973_p7, %p967_p2 }
  0x63   : > { %776 = vmatpush3.bf16.msra.mxu1 %v878_v11 }
  0x64   : > { %754 = vmatpush3.bf16.msra.mxu0 %v871_v3  ;;  %777 = vmatprep.subr.bf16.mxu1 %v879_v12 }
  0x65   : > { %755 = vmatprep.subr.bf16.mxu0 %v872_v7 }
  0x67   : > { %778 = vmatpush3.bf16.msra.mxu1 %v879_v12 }
  0x68   : > { %756 = vmatpush3.bf16.msra.mxu0 %v872_v7  ;;  %779 = vmatprep.subr.bf16.mxu1 %v880_v14 }
  0x69   : > { %757 = vmatprep.subr.bf16.mxu0 %v873_v10 }
  0x6b   : > { %780 = vmatpush3.bf16.msra.mxu1 %v880_v14 }
  0x6c   : > { %758 = vmatpush3.bf16.msra.mxu0 %v873_v10  ;;  %781 = vmatprep.subr.bf16.mxu1 %v881_v25 }
  0x6d   : > { %759 = vmatprep.subr.bf16.mxu0 %v874_v13 }
  0x6f   : > { %782 = vmatpush3.bf16.msra.mxu1 %v881_v25 }
  0x70   : > { %760 = vmatpush3.bf16.msra.mxu0 %v874_v13  ;;  %783 = vmatprep.subr.bf16.mxu1 %v882_v26 }
  0x71   : > { %761 = vmatprep.subr.bf16.mxu0 %v875_v15 }
  0x73   : > { %784 = vmatpush3.bf16.msra.mxu1 %v882_v26 }
  0x74   : > { %762 = vmatpush3.bf16.msra.mxu0 %v875_v15  ;;  %785 = vmatprep.subr.bf16.mxu1 %v883_v27 }
  0x77   : > { %764 = vmatmul.mubr.bf16.vlgmr.msra.gmra.mxu0 %v284_v20  ;;  %786 = vmatpush3.bf16.msra.mxu1 %v883_v27 }
  0x78   : > { %767 = vmatprep.mubr.bf16.mxu0 %v285_v21 }
  0x7f   : > { %768 = vmatmul.mubr.bf16.gmra.mxu0 %v286_v24 }
 0x137   : > { %v765_v28 = vpop.f32.mrf.mxu0 }
 0x138   : > { %v401_v34 = vadd.f32 %v765_v28, %v698_v30 }
 0x139   : > { %v392_v29 = vpop.f32.mrf.mxu0 }
 0x13a   : > { %v393_v32 = vadd.f32 %v698_v30, %v392_v29  ;;  %v425_v41 = vmax.f32 %v401_v34, 0.0 }
 0x13b   : > { %v766_v31 = vpop.f32.mrf.mxu0 }
 0x13c   : > { %v404_v33 = vadd.f32 %v766_v31, %v698_v30  ;;  %v423_v39 = vmax.f32 %v393_v32, 0.0 }
 0x13d   : > { %v395_v35 = vpop.f32.mrf.mxu0 }
 0x13e   : > { %v396_v36 = vadd.f32 %v698_v30, %v395_v35  ;;  %v426_v37 = vmax.f32 %v404_v33, 0.0 }
 0x13f   : > { %v769_v38 = vpop.f32.mrf.mxu0 }
 0x140   : > { %v424_v40 = vmax.f32 %v396_v36, 0.0  ;;  %v432_v44 = vpack.c.bf16 %v426_v37, %v425_v41  ;;  %v417_v48 = vadd.f32 %v769_v38, %v698_v30 }
 0x141   : > { %v408_v42 = vpop.f32.mrf.mxu0 }
 0x142   : > { %v431_v43 = vpack.c.bf16 %v424_v40, %v423_v39  ;;  %v409_v46 = vadd.f32 %v698_v30, %v408_v42  ;;  %v429_v54 = vmax.f32 %v417_v48, 0.0 }
 0x143   : > { %v770_v45 = vpop.f32.mrf.mxu0 }
 0x144   : > { %v420_v47 = vadd.f32 %v770_v45, %v698_v30  ;;  %787 = vmatprep.mubr.bf16.mxu1 %v431_v43  ;;  %v427_v52 = vmax.f32 %v409_v46, 0.0 }
 0x145   : > { %v411_v49 = vpop.f32.mrf.mxu0  ;;  %788 = vmatmul.mubr.bf16.vlgmr.msra.gmra.mxu1 %v432_v44 }
 0x146   : > { %v412_v50 = vadd.f32 %v698_v30, %v411_v49  ;;  %v430_v51 = vmax.f32 %v420_v47, 0.0 }
 0x148   : > { %v428_v53 = vmax.f32 %v412_v50, 0.0  ;;  %v434_v56 = vpack.c.bf16 %v430_v51, %v429_v54 }
 0x14a   : > { %v433_v55 = vpack.c.bf16 %v428_v53, %v427_v52 }
 0x14c   : > { %791 = vmatprep.mubr.bf16.mxu1 %v433_v55 }
 0x14d   : > { %792 = vmatmul.mubr.bf16.gmra.mxu1 %v434_v56 }
 0x205   : > { %v789_v58 = vpop.f32.mrf.mxu1 }
 0x206   : > { %v549_v59 = vadd.f32 %v789_v58, %v707_v57 }
 0x207   : > { %v540_v60 = vpop.f32.mrf.mxu1 }
 0x208   : > { %573 = vst [vmem:[%s271_s11 + $0x10] sm:$0xff] %v549_v59  ;;  %v541_v61 = vadd.f32 %v707_v57, %v540_v60 }
 0x209   : > { %v790_v62 = vpop.f32.mrf.mxu1 }
 0x20a   : > { %571 = vst [vmem:[%s271_s11] sm:$0xff] %v541_v61  ;;  %v552_v63 = vadd.f32 %v790_v62, %v707_v57 }
 0x20b   : > { %v543_v0 = vpop.f32.mrf.mxu1 }
 0x20c   : > { %574 = vst [vmem:[%s271_s11 + $0x18] sm:$0xff] %v552_v63  ;;  %v544_v1 = vadd.f32 %v707_v57, %v543_v0 }
 0x20d   : > { %v793_v2 = vpop.f32.mrf.mxu1 }
 0x20e   : > { %572 = vst [vmem:[%s271_s11 + $0x8] sm:$0xff] %v544_v1  ;;  %v565_v3 = vadd.f32 %v793_v2, %v707_v57 }
 0x20f   : > { %v556_v4 = vpop.f32.mrf.mxu1 }
 0x210   : > { %577 = vst [vmem:[%s271_s11 + $0x30] sm:$0xff] %v565_v3  ;;  %v557_v5 = vadd.f32 %v707_v57, %v556_v4 }
 0x211   : > { %v794_v6 = vpop.f32.mrf.mxu1 }
 0x212   : > { %575 = vst [vmem:[%s271_s11 + $0x20] sm:$0xff] %v557_v5  ;;  %v568_v7 = vadd.f32 %v794_v6, %v707_v57 }
 0x213   : > { %v559_v8 = vpop.f32.mrf.mxu1 }
 0x214   : > { %578 = vst [vmem:[%s271_s11 + $0x38] sm:$0xff] %v568_v7  ;;  %v560_v9 = vadd.f32 %v707_v57, %v559_v8 }
 0x216   : > { %576 = vst [vmem:[%s271_s11 + $0x28] sm:$0xff] %v560_v9 }
 0x217   : > { %977 = shalt.err (!%p974_p9)
}
 0x218   : > { %s978_s30 = scalar_lea.hbm %s1238_s9, 1024  ;;  %s982_s8 = scalar_lea.hbm %s1285_s5, 4096 }
 0x219   : > { %p979_p12 = scmp.ne.s32.totalorder %s1238_s9, %s978_s30  ;;  %p983_p4 = scmp.lt.s32.totalorder %s1238_s9, %s1285_s5 }
 0x21a   : > { %p984_p8 = scmp.lt.s32.totalorder %s982_s8, %s978_s30 }
 0x21b   : > { %p980_p3 = pnand %p979_p12, %p1301_p0 }
 0x21c   : > { %p985_p5 = por %p984_p8, %p983_p4 }
 0x21d   : > { %p981_p13 = pneg %p980_p3 }
 0x21f   : > { %p986_p10 = pnand %p985_p5, %p981_p13 }
 0x221   : > { %989 = shalt.err (!%p986_p10)
}
 0x222   : > { %s1042_s28 = smov 128   ;;  %s1043_s6 = smov 8  }
 0x223   : > { %805 = dma.vmem_to_hbm [thread:$0]  (%p1301_p0), %s1233_s12, 1024, %s1238_s9, %s580_s13, %s1042_s28, %s1042_s28, %s1043_s6  }
 0x224 PF: > { %p827_p1 = scmp.ge.s32.totalorder %s1032_s21, 2  ;;  %s608_s7 = sand.u32 1, %s1020_s18  }
 0x225   : > { %p1302_p2 = scmp.ne.s32.totalorder %s1291_s25, 0  ;;  %s609_s14 = scalar_lea.sflag [#allocation4], %s608_s7 }
 0x227   : > { %p819_p6 = pnand %p827_p1, %p1302_p2 }
 0x229   : > { %p820_p11 = pneg %p819_p6 }
 0x22b   : > { %1015 = dma.done.wait (%p820_p11), %s609_s14, 1024  }
 0x22c   : > { %1017 = vsyncadd (%p820_p11), %s609_s14, 4294966272  ;;  %p19_p7 = scmp.ge.s32.totalorder %s1145_s15, 6   ;;  %s1303_s18 = smov %s1024_s19 }
 0x22d   : > { %s1304_s19 = smov %s1028_s20  ;;  %s1305_s20 = smov %s1161_s27 }
 0x22e   : > { %s1306_s21 = smov %s1145_s15  ;;  %21 = sbr.rel (!%p19_p7) target bundleno = 6 (0x6), region = 93 }
 0x233   :  { %614 = vsyncpa [#allocation3], 1 }
 0x234   :  { %616 = vsyncpa [#allocation3 + $0x1], 1 }
 0x235   :  { %617 = vsyncpa [#allocation6], 1 }
 0x236   :  { %618 = vsyncpa [#allocation4], 1 }
 0x237   :  { %620 = vsyncpa [#allocation4 + $0x1], 1 }

// kernel: tpu_custom_call.1
= control target key start
LH: loop header
LB: loop body
LE: loop exit
PB: predicated region body
PF: predicated region fallthrough
CT: control target
= control target key end

     0   :  { %10 = vsyncpa [#allocation3], 0  ;;  %s1280_s0 = inlined_call_operand.hbm [shape: f32[256,128], index: 0, kind: input, shape index: {}]   ;;  %s1281_s1 = inlined_call_operand.hbm [shape: bf16[128,128], index: 1, kind: input, shape index: {}]   ;;  %s1282_s2 = inlined_call_operand.vmem [shape: f32[1,128], index: 2, kind: input, shape index: {}]   ;;  %s1283_s3 = inlined_call_operand.hbm [shape: bf16[128,128], index: 3, kind: input, shape index: {}]   ;;  %s1284_s4 = inlined_call_operand.vmem [shape: f32[1,128], index: 4, kind: input, shape index: {}]   ;;  %s1285_s5 = inlined_call_operand.hbm [shape: f32[256,128], index: 5, kind: output, shape index: {}]  }
   0x1   :  { %12 = vsyncpa [#allocation3 + $0x1], 0 }
   0x2   :  { %13 = vsyncpa [#allocation6], 0 }
   0x3   :  { %14 = vsyncpa [#allocation4], 0 }
   0x4   :  { %16 = vsyncpa [#allocation4 + $0x1], 0  ;;  %s1074_s18 = smov 0   ;;  %s1076_s19 = smov 0  }
   0x5   :  { %s1078_s20 = smov 0   ;;  %s1080_s21 = smov 0  }
   0x6 LB: > { %s1095_s22 = sadd.s32 4294967295, %s1032_s21   ;;  %s685_s23 = sadd.s32 4294967294, %s1032_s21   ;;  %s1032_s21 = sphi %s1080_s21, %s1306_s21   ;;  %s1028_s20 = sphi %s1078_s20, %s1305_s20   ;;  %s1024_s19 = sphi %s1076_s19, %s1304_s19   ;;  %s1020_s18 = sphi %s1074_s18, %s1303_s18  }
   0x7   : > { %p42_p0 = scmp.ne.s32.totalorder %s1024_s19, %s1020_s18  ;;  %p1286_p1 = scmp.eq.s32.totalorder %s1095_s22, 0 }
   0x8   : > { %p156_p3 = scmp.eq.s32.totalorder %s685_s23, 3  ;;  %p686_p5 = scmp.ge.s32.totalorder %s1032_s21, 1 }
   0x9   : > { %p1104_p4 = por %p1286_p1, %p42_p0  ;;  %p163_p7 = scmp.lt.s32.totalorder %s1032_s21, 5 }
   0xa   : > { %p1109_p6 = por %p156_p3, %p42_p0  ;;  %s1034_s27 = smov [#allocation5]  }
   0xb   : > { %s1290_s24 = scalar_select %p1104_p4, 1, 0 }
   0xc   : > { %s1291_s25 = scalar_select %p1109_p6, 1, 0 }
   0xd   : > { %p1114_p8 = pnand %p686_p5, %p163_p7  ;;  %s175_s28 = sshll.u32 %s1034_s27, 4  ;;  %s176_s28 = int_to_ptr.vmem [resolvable:$true] %s175_s28 }
   0xe   : > { %s1035_s30 = smov [#allocation7]   ;;  %s895_s7 = scalar_lea.vmem %s176_s28, 1024 }
   0xf   : > { %s1292_s26 = scalar_select %p1114_p8, 1, 0 }
  0x10   : > { %p807_p9 = pneg %p1114_p8  ;;  %s191_s6 = sshll.u32 %s1035_s30, 4  ;;  %s192_s6 = int_to_ptr.vmem [resolvable:$true] %s191_s6 }
  0x11   : > { %p896_p12 = scmp.ne.s32.totalorder %s176_s28, %s895_s7  ;;  %p903_p3 = scmp.lt.s32.totalorder %s176_s28, %s176_s28 }
  0x12   : > { %p1122_p10 = pnand %p807_p9, %p1286_p1  ;;  %p904_p5 = scmp.lt.s32.totalorder %s895_s7, %s895_s7 }
  0x14   : > { %p886_p11 = pneg %p1122_p10  ;;  %p905_p7 = por %p904_p5, %p903_p3 }
  0x16   : > { %p898_p13 = pnand %p896_p12, %p886_p11 }
  0x18   : > { %p899_p0 = pneg %p898_p13 }
  0x1a   : > { %p906_p9 = pnand %p905_p7, %p899_p0 }
  0x1c   : > { %909 = shalt.err (!%p906_p9)
}
  0x1d   : > { %s1036_s8 = smov 64   ;;  %s1037_s9 = smov 4  }
  0x1e   : > { %810 = dma.hbm_to_vmem [thread:$0]  (!%p1122_p10), %s1281_s1, 1024, %s176_s28, [#allocation6], %s1036_s8, %s1036_s8, %s1037_s9  }
  0x1f   : > { %s921_s12 = scalar_lea.vmem %s192_s6, 1024  ;;  %p929_p2 = scmp.lt.s32.totalorder %s192_s6, %s192_s6 }
  0x20   : > { %p922_p1 = scmp.ne.s32.totalorder %s192_s6, %s921_s12  ;;  %p930_p6 = scmp.lt.s32.totalorder %s921_s12, %s921_s12 }
  0x22   : > { %p924_p12 = pnand %p922_p1, %p886_p11  ;;  %p931_p3 = por %p930_p6, %p929_p2 }
  0x24   : > { %p925_p13 = pneg %p924_p12 }
  0x26   : > { %p932_p0 = pnand %p931_p3, %p925_p13 }
  0x28   : > { %935 = shalt.err (!%p932_p0)
}
  0x29   : > { %813 = dma.hbm_to_vmem [thread:$0]  (!%p1122_p10), %s1283_s3, 1024, %s192_s6, [#allocation6], %s1036_s8, %s1036_s8, %s1037_s9  }
  0x2a   : > { %s1145_s15 = sadd.s32 1, %s1032_s21   ;;  %s29_s16 = sadd.s32 1, %s1028_s20 }
  0x2b   : > { %s26_s17 = ssub.s32 %s1032_s21, %s1145_s15  ;;  %p36_p1 = scmp.ne.s32.totalorder %s1028_s20, %s1024_s19 }
  0x2c   : > { %p27_p2 = scmp.eq.s32.totalorder %s26_s17, 0  ;;  %p37_p6 = scmp.eq.s32.totalorder %s1032_s21, 0 }
  0x2d   : > { %p1294_p11 = scmp.eq.s32.totalorder %s1095_s22, 3  ;;  %p824_p7 = scmp.lt.s32.totalorder %s1032_s21, 4 }
  0x2e   : > { %s1161_s27 = scalar_select %p27_p2, %s1028_s20, %s29_s16  }
  0x2f   : > { %p1155_p5 = por %p1294_p11, %p36_p1  ;;  %p38_p9 = por %p37_p6, %p36_p1 }
  0x30   : > { %s208_s28 = sand.u32 1, %s1028_s20   ;;  %s721_s30 = sshll.u32 %s1032_s21, 10 }
  0x31   : > { %s1295_s23 = scalar_select %p1155_p5, 1, 0 }
  0x32   : > { %s690_s29 = sshll.u32 %s208_s28, 6  ;;  %s1168_s8 = scalar_lea.hbm %s1280_s0, %s721_s30 }
  0x33   : > { %s212_s9 = scalar_lea.vmem [#allocation2], %s690_s29  ;;  %p1172_p10 = pnand %p824_p7, %p38_p9 }
  0x34   : > { %s219_s10 = sshll.u32 %s212_s9, 4  ;;  %s1176_s12 = scalar_lea.sflag [#allocation3], %s208_s28  ;;  %s1170_s10 = int_to_ptr.vmem [resolvable:$true] %s219_s10 }
  0x35   : > { %s936_s13 = scalar_lea.hbm %s1168_s8, 1024  ;;  %p938_p13 = pneg %p1172_p10 }
  0x36   : > { %p937_p12 = scmp.ne.s32.totalorder %s1168_s8, %s936_s13  ;;  %s941_s17 = scalar_lea.hbm %s1280_s0, 4096 }
  0x37   : > { %p942_p1 = scmp.lt.s32.totalorder %s1168_s8, %s1280_s0  ;;  %p943_p2 = scmp.lt.s32.totalorder %s941_s17, %s936_s13 }
  0x38   : > { %p939_p3 = pnand %p938_p13, %p937_p12 }
  0x39   : > { %p944_p6 = por %p943_p2, %p942_p1 }
  0x3a   : > { %p940_p0 = pneg %p939_p3 }
  0x3c   : > { %p945_p11 = pnand %p944_p6, %p940_p0 }
  0x3e   : > { %948 = shalt.err (!%p945_p11)
}
  0x3f   : > { %s949_s28 = scalar_lea.vmem %s1170_s10, 1024  ;;  %s1038_s6 = smov [#allocation2]  }
  0x40   : > { %p950_p7 = scmp.ne.s32.totalorder %s1170_s10, %s949_s28  ;;  %s954_s7 = sshll.u32 %s1038_s6, 4  ;;  %s955_s7 = int_to_ptr.vmem [resolvable:$false] %s954_s7 }
  0x41   : > { %s956_s9 = scalar_lea.vmem %s955_s7, 2048  ;;  %p957_p3 = scmp.lt.s32.totalorder %s1170_s10, %s955_s7 }
  0x42   : > { %p952_p9 = pnand %p950_p7, %p938_p13  ;;  %p958_p5 = scmp.lt.s32.totalorder %s956_s9, %s949_s28 }
  0x44   : > { %p953_p12 = pneg %p952_p9  ;;  %p959_p4 = por %p958_p5, %p957_p3 }
  0x46   : > { %p960_p8 = pnand %p959_p4, %p953_p12 }
  0x48   : > { %963 = shalt.err (!%p960_p8)
}
  0x49   : > { %s1039_s13 = smov 128   ;;  %s1040_s14 = smov 8  }
  0x4a   : > { %817 = dma.hbm_to_vmem [thread:$0]  (!%p1172_p10), %s1168_s8, 1024, %s1170_s10, %s1176_s12, %s1039_s13, %s1039_s13, %s1040_s14  }
  0x4b   : > { %p1297_p13 = scmp.ne.s32.totalorder %s1292_s26, 0 }
  0x4c   : > { %s1200_s16 = sand.u32 (!%p1297_p13), 1, %s1024_s19   ;;  %p1298_p4 = scmp.ne.s32.totalorder (!%p1297_p13), %s1290_s24, 0 }
  0x4d   : > { %231 = sbr.rel (%p1297_p13) target bundleno = 548 (0x224), region = 40  ;;  %s694_s17 = sshll.u32 (!%p1297_p13), %s1200_s16, 6 }
  0x4e   : > { %s234_s29 = scalar_lea.sflag (!%p1297_p13), [#allocation3], %s1200_s16  ;;  %s1206_s30 = scalar_lea.vmem (!%p1297_p13), [#allocation2], %s694_s17 }
  0x52   : > { %1007 = dma.done.wait (%p1298_p4), %s234_s29, 1024  }
  0x53   : > { %1009 = vsyncadd (%p1298_p4), %s234_s29, 4294966272  ;;  %p1299_p8 = scmp.eq.s32.totalorder %s1095_s22, 0 }
  0x55   : > { %1011 = dma.done.wait (%p1299_p8), [#allocation6], 2048   ;;  %p1300_p5 = pmov %p1299_p8 }
  0x56   : > { %v868_v0 = vld [vmem:[#allocation5 + $0x38] sm:$0xff]   ;;  %v869_v1 = vld [vmem:[#allocation5 + $0x30] sm:$0xff]   ;;  %v870_v2 = vld [vmem:[#allocation5 + $0x28] sm:$0xff]   ;;  %s271_s11 = scalar_lea.vmem [#allocation8], %s694_s17  ;;  %s722_s28 = sshll.u32 %s1095_s22, 10 }
  0x57   : > { %1013 = vsyncadd (%p1300_p5), [#allocation6], 4294965248  ;;  %747 = vmatprep.subr.bf16.mxu0 %v868_v0  ;;  %v871_v3 = vld [vmem:[#allocation5 + $0x20] sm:$0xff]   ;;  %v276_v5 = vld [vmem:[%s1206_s30 + $0x8] sm:$0xff]  ;;  %s593_s12 = sshll.u32 %s271_s11, 4  ;;  %s1238_s9 = scalar_lea.hbm %s1285_s5, %s722_s28  ;;  %s1233_s12 = int_to_ptr.vmem [resolvable:$true] %s593_s12 }
  0x58   : > { %748 = vmatpush3.bf16.msra.mxu0 %v868_v0  ;;  %v275_v4 = vld [vmem:[%s1206_s30] sm:$0xff]  ;;  %v872_v7 = vld [vmem:[#allocation5 + $0x18] sm:$0xff]   ;;  %v877_v9 = vld [vmem:[#allocation7 + $0x30] sm:$0xff]   ;;  %s580_s13 = scalar_lea.sflag [#allocation4], %s1200_s16  ;;  %s964_s14 = scalar_lea.vmem %s1233_s12, 1024 }
  0x59   : > { %749 = vmatprep.subr.bf16.mxu0 %v869_v1  ;;  %v283_v6 = vpack.c.bf16 %v276_v5, %v275_v4  ;;  %v876_v8 = vld [vmem:[#allocation7 + $0x38] sm:$0xff]   ;;  %v873_v10 = vld [vmem:[#allocation5 + $0x10] sm:$0xff]   ;;  %v878_v11 = vld [vmem:[#allocation7 + $0x28] sm:$0xff]   ;;  %p965_p10 = scmp.ne.s32.totalorder %s1233_s12, %s964_s14  ;;  %p1301_p0 = scmp.ne.s32.totalorder %s1295_s23, 0 }
  0x5a   : > { %771 = vmatprep.subr.bf16.mxu1 %v876_v8  ;;  %v879_v12 = vld [vmem:[#allocation7 + $0x20] sm:$0xff]   ;;  %v874_v13 = vld [vmem:[#allocation5 + $0x8] sm:$0xff]   ;;  %v880_v14 = vld [vmem:[#allocation7 + $0x18] sm:$0xff]   ;;  %s1041_s22 = smov [#allocation8]  }
  0x5b   : > { %763 = vmatprep.mubr.bf16.mxu0 %v283_v6  ;;  %772 = vmatpush3.bf16.msra.mxu1 %v876_v8  ;;  %v875_v15 = vld [vmem:[#allocation5] sm:$0xff]   ;;  %v277_v16 = vld [vmem:[%s1206_s30 + $0x10] sm:$0xff]  ;;  %v278_v17 = vld [vmem:[%s1206_s30 + $0x18] sm:$0xff]  ;;  %p966_p1 = pnand %p965_p10, %p1301_p0  ;;  %s968_s17 = sshll.u32 %s1041_s22, 4  ;;  %s969_s17 = int_to_ptr.vmem [resolvable:$false] %s968_s17 }
  0x5c   : > { %750 = vmatpush3.bf16.msra.mxu0 %v869_v1  ;;  %773 = vmatprep.subr.bf16.mxu1 %v877_v9  ;;  %v279_v18 = vld [vmem:[%s1206_s30 + $0x20] sm:$0xff]  ;;  %v280_v19 = vld [vmem:[%s1206_s30 + $0x28] sm:$0xff]  ;;  %v284_v20 = vpack.c.bf16 %v278_v17, %v277_v16  ;;  %v281_v22 = vld [vmem:[%s1206_s30 + $0x30] sm:$0xff]  ;;  %s970_s29 = scalar_lea.vmem %s969_s17, 2048  ;;  %p971_p6 = scmp.lt.s32.totalorder %s1233_s12, %s969_s17 }
  0x5d   : > { %751 = vmatprep.subr.bf16.mxu0 %v870_v2  ;;  %v285_v21 = vpack.c.bf16 %v280_v19, %v279_v18  ;;  %v282_v23 = vld [vmem:[%s1206_s30 + $0x38] sm:$0xff]  ;;  %v881_v25 = vld [vmem:[#allocation7 + $0x10] sm:$0xff]   ;;  %v882_v26 = vld [vmem:[#allocation7 + $0x8] sm:$0xff]   ;;  %p967_p2 = pneg %p966_p1  ;;  %p972_p11 = scmp.lt.s32.totalorder %s970_s29, %s964_s14 }
  0x5e   : > { %v286_v24 = vpack.c.bf16 %v282_v23, %v281_v22  ;;  %v883_v27 = vld [vmem:[#allocation7] sm:$0xff]  }
  0x5f   : > { %774 = vmatpush3.bf16.msra.mxu1 %v877_v9  ;;  %v698_v30 = vld [vmem:[%s1282_s2] ss:$0 sm:$0xff]  ;;  %p973_p7 = por %p972_p11, %p971_p6 }
  0x60   : > { %752 = vmatpush3.bf16.msra.mxu0 %v870_v2  ;;  %775 = vmatprep.subr.bf16.mxu1 %v878_v11  ;;  %v707_v57 = vld [vmem:[%s1284_s4] ss:$0 sm:$0xff] }
  0x61   : > { %753 = vmatprep.subr.bf16.mxu0 %v871_v3  ;;  %p974_p9 = pnand %p973_p7, %p967_p2 }
  0x63   : > { %776 = vmatpush3.bf16.msra.mxu1 %v878_v11 }
  0x64   : > { %754 = vmatpush3.bf16.msra.mxu0 %v871_v3  ;;  %777 = vmatprep.subr.bf16.mxu1 %v879_v12 }
  0x65   : > { %755 = vmatprep.subr.bf16.mxu0 %v872_v7 }
  0x67   : > { %778 = vmatpush3.bf16.msra.mxu1 %v879_v12 }
  0x68   : > { %756 = vmatpush3.bf16.msra.mxu0 %v872_v7  ;;  %779 = vmatprep.subr.bf16.mxu1 %v880_v14 }
  0x69   : > { %757 = vmatprep.subr.bf16.mxu0 %v873_v10 }
  0x6b   : > { %780 = vmatpush3.bf16.msra.mxu1 %v880_v14 }
  0x6c   : > { %758 = vmatpush3.bf16.msra.mxu0 %v873_v10  ;;  %781 = vmatprep.subr.bf16.mxu1 %v881_v25 }
  0x6d   : > { %759 = vmatprep.subr.bf16.mxu0 %v874_v13 }
  0x6f   : > { %782 = vmatpush3.bf16.msra.mxu1 %v881_v25 }
  0x70   : > { %760 = vmatpush3.bf16.msra.mxu0 %v874_v13  ;;  %783 = vmatprep.subr.bf16.mxu1 %v882_v26 }
  0x71   : > { %761 = vmatprep.subr.bf16.mxu0 %v875_v15 }
  0x73   : > { %784 = vmatpush3.bf16.msra.mxu1 %v882_v26 }
  0x74   : > { %762 = vmatpush3.bf16.msra.mxu0 %v875_v15  ;;  %785 = vmatprep.subr.bf16.mxu1 %v883_v27 }
  0x77   : > { %764 = vmatmul.mubr.bf16.vlgmr.msra.gmra.mxu0 %v284_v20  ;;  %786 = vmatpush3.bf16.msra.mxu1 %v883_v27 }
  0x78   : > { %767 = vmatprep.mubr.bf16.mxu0 %v285_v21 }
  0x7f   : > { %768 = vmatmul.mubr.bf16.gmra.mxu0 %v286_v24 }
 0x137   : > { %v765_v28 = vpop.f32.mrf.mxu0 }
 0x138   : > { %v401_v34 = vadd.f32 %v765_v28, %v698_v30 }
 0x139   : > { %v392_v29 = vpop.f32.mrf.mxu0 }
 0x13a   : > { %v393_v32 = vadd.f32 %v698_v30, %v392_v29  ;;  %v425_v41 = vmax.f32 %v401_v34, 0.0 }
 0x13b   : > { %v766_v31 = vpop.f32.mrf.mxu0 }
 0x13c   : > { %v404_v33 = vadd.f32 %v766_v31, %v698_v30  ;;  %v423_v39 = vmax.f32 %v393_v32, 0.0 }
 0x13d   : > { %v395_v35 = vpop.f32.mrf.mxu0 }
 0x13e   : > { %v396_v36 = vadd.f32 %v698_v30, %v395_v35  ;;  %v426_v37 = vmax.f32 %v404_v33, 0.0 }
 0x13f   : > { %v769_v38 = vpop.f32.mrf.mxu0 }
 0x140   : > { %v424_v40 = vmax.f32 %v396_v36, 0.0  ;;  %v432_v44 = vpack.c.bf16 %v426_v37, %v425_v41  ;;  %v417_v48 = vadd.f32 %v769_v38, %v698_v30 }
 0x141   : > { %v408_v42 = vpop.f32.mrf.mxu0 }
 0x142   : > { %v431_v43 = vpack.c.bf16 %v424_v40, %v423_v39  ;;  %v409_v46 = vadd.f32 %v698_v30, %v408_v42  ;;  %v429_v54 = vmax.f32 %v417_v48, 0.0 }
 0x143   : > { %v770_v45 = vpop.f32.mrf.mxu0 }
 0x144   : > { %v420_v47 = vadd.f32 %v770_v45, %v698_v30  ;;  %787 = vmatprep.mubr.bf16.mxu1 %v431_v43  ;;  %v427_v52 = vmax.f32 %v409_v46, 0.0 }
 0x145   : > { %v411_v49 = vpop.f32.mrf.mxu0  ;;  %788 = vmatmul.mubr.bf16.vlgmr.msra.gmra.mxu1 %v432_v44 }
 0x146   : > { %v412_v50 = vadd.f32 %v698_v30, %v411_v49  ;;  %v430_v51 = vmax.f32 %v420_v47, 0.0 }
 0x148   : > { %v428_v53 = vmax.f32 %v412_v50, 0.0  ;;  %v434_v56 = vpack.c.bf16 %v430_v51, %v429_v54 }
 0x14a   : > { %v433_v55 = vpack.c.bf16 %v428_v53, %v427_v52 }
 0x14c   : > { %791 = vmatprep.mubr.bf16.mxu1 %v433_v55 }
 0x14d   : > { %792 = vmatmul.mubr.bf16.gmra.mxu1 %v434_v56 }
 0x205   : > { %v789_v58 = vpop.f32.mrf.mxu1 }
 0x206   : > { %v549_v59 = vadd.f32 %v789_v58, %v707_v57 }
 0x207   : > { %v540_v60 = vpop.f32.mrf.mxu1 }
 0x208   : > { %573 = vst [vmem:[%s271_s11 + $0x10] sm:$0xff] %v549_v59  ;;  %v541_v61 = vadd.f32 %v707_v57, %v540_v60 }
 0x209   : > { %v790_v62 = vpop.f32.mrf.mxu1 }
 0x20a   : > { %571 = vst [vmem:[%s271_s11] sm:$0xff] %v541_v61  ;;  %v552_v63 = vadd.f32 %v790_v62, %v707_v57 }
 0x20b   : > { %v543_v0 = vpop.f32.mrf.mxu1 }
 0x20c   : > { %574 = vst [vmem:[%s271_s11 + $0x18] sm:$0xff] %v552_v63  ;;  %v544_v1 = vadd.f32 %v707_v57, %v543_v0 }
 0x20d   : > { %v793_v2 = vpop.f32.mrf.mxu1 }
 0x20e   : > { %572 = vst [vmem:[%s271_s11 + $0x8] sm:$0xff] %v544_v1  ;;  %v565_v3 = vadd.f32 %v793_v2, %v707_v57 }
 0x20f   : > { %v556_v4 = vpop.f32.mrf.mxu1 }
 0x210   : > { %577 = vst [vmem:[%s271_s11 + $0x30] sm:$0xff] %v565_v3  ;;  %v557_v5 = vadd.f32 %v707_v57, %v556_v4 }
 0x211   : > { %v794_v6 = vpop.f32.mrf.mxu1 }
 0x212   : > { %575 = vst [vmem:[%s271_s11 + $0x20] sm:$0xff] %v557_v5  ;;  %v568_v7 = vadd.f32 %v794_v6, %v707_v57 }
 0x213   : > { %v559_v8 = vpop.f32.mrf.mxu1 }
 0x214   : > { %578 = vst [vmem:[%s271_s11 + $0x38] sm:$0xff] %v568_v7  ;;  %v560_v9 = vadd.f32 %v707_v57, %v559_v8 }
 0x216   : > { %576 = vst [vmem:[%s271_s11 + $0x28] sm:$0xff] %v560_v9 }
 0x217   : > { %977 = shalt.err (!%p974_p9)
}
 0x218   : > { %s978_s30 = scalar_lea.hbm %s1238_s9, 1024  ;;  %s982_s8 = scalar_lea.hbm %s1285_s5, 4096 }
 0x219   : > { %p979_p12 = scmp.ne.s32.totalorder %s1238_s9, %s978_s30  ;;  %p983_p4 = scmp.lt.s32.totalorder %s1238_s9, %s1285_s5 }
 0x21a   : > { %p984_p8 = scmp.lt.s32.totalorder %s982_s8, %s978_s30 }
 0x21b   : > { %p980_p3 = pnand %p979_p12, %p1301_p0 }
 0x21c   : > { %p985_p5 = por %p984_p8, %p983_p4 }
 0x21d   : > { %p981_p13 = pneg %p980_p3 }
 0x21f   : > { %p986_p10 = pnand %p985_p5, %p981_p13 }
 0x221   : > { %989 = shalt.err (!%p986_p10)
}
 0x222   : > { %s1042_s28 = smov 128   ;;  %s1043_s6 = smov 8  }
 0x223   : > { %805 = dma.vmem_to_hbm [thread:$0]  (%p1301_p0), %s1233_s12, 1024, %s1238_s9, %s580_s13, %s1042_s28, %s1042_s28, %s1043_s6  }
 0x224 PF: > { %p827_p1 = scmp.ge.s32.totalorder %s1032_s21, 2  ;;  %s608_s7 = sand.u32 1, %s1020_s18  }
 0x225   : > { %p1302_p2 = scmp.ne.s32.totalorder %s1291_s25, 0  ;;  %s609_s14 = scalar_lea.sflag [#allocation4], %s608_s7 }
 0x227   : > { %p819_p6 = pnand %p827_p1, %p1302_p2 }
 0x229   : > { %p820_p11 = pneg %p819_p6 }
 0x22b   : > { %1015 = dma.done.wait (%p820_p11), %s609_s14, 1024  }
 0x22c   : > { %1017 = vsyncadd (%p820_p11), %s609_s14, 4294966272  ;;  %p19_p7 = scmp.ge.s32.totalorder %s1145_s15, 6   ;;  %s1303_s18 = smov %s1024_s19 }
 0x22d   : > { %s1304_s19 = smov %s1028_s20  ;;  %s1305_s20 = smov %s1161_s27 }
 0x22e   : > { %s1306_s21 = smov %s1145_s15  ;;  %21 = sbr.rel (!%p19_p7) target bundleno = 6 (0x6), region = 93 }
 0x233   :  { %614 = vsyncpa [#allocation3], 1 }
 0x234   :  { %616 = vsyncpa [#allocation3 + $0x1], 1 }
 0x235   :  { %617 = vsyncpa [#allocation6], 1 }
 0x236   :  { %618 = vsyncpa [#allocation4], 1 }
 0x237   :  { %620 = vsyncpa [#allocation4 + $0x1], 1 }

</bundles_post_ra>
